<compile_context>
chip_gen: v6e
topology: v6e:2x2x1
jax: 0.10.0
libtpu: 0.0.40
codegen_flags: <defaults>
</compile_context>

<pallas_src>
import numpy as np
import jax
import jax.numpy as jnp
from jax import lax
from jax.experimental import pallas as pl
from jax.experimental.pallas import tpu as pltpu

LANE = 128  # TPU lane width
SUB = 8     # float32 sublane granularity


# ----------------------------------------------------------------------------
# Parameter construction (glue, plain JAX) -- mirrors PMDElement/PDLElement init
# ----------------------------------------------------------------------------
def make_gamma(rho: float, key) -> jnp.ndarray:
    """Build the 2x2 complex64 Gamma matrix of PDLElement deterministically."""
    # PMDElement(0, 0, 0, 0).__init__ rotation part:
    #   g ~ N(0,1)^4 ; alpha0 = g/||g|| ; theta = acos(alpha0[0])
    #   a = alpha0[1:] / sin(theta)
    #   J = cos(theta)*I - 1j*sin(theta)*sum_k a_k * sigma_k   (J_k1 = I)
    g = jax.random.normal(key, (4,), dtype=jnp.float32)
    alpha0 = g / jnp.linalg.norm(g)
    theta = jnp.arccos(alpha0[0])
    # NOTE: same divide-by-sin(theta) hazard as the torch original if
    # alpha0[0] ~ +-1; intentionally not guarded to keep semantics identical.
    a = alpha0[1:] / jnp.sin(theta)

    sigma = jnp.array(
        [[[1, 0], [0, -1]],
         [[0, 1], [1, 0]],
         [[0, -1j], [1j, 0]]],
        dtype=jnp.complex64,
    )
    eye2 = jnp.eye(2, dtype=jnp.complex64)
    rot = (eye2 * jnp.cos(theta).astype(jnp.complex64)
           - 1j * jnp.sum(a.astype(jnp.complex64)[:, None, None] * sigma, axis=0)
           * jnp.sin(theta).astype(jnp.complex64))

    gamma_diag = jnp.sqrt(
        jnp.array([[1.0 + rho, 0.0], [0.0, 1.0 - rho]], dtype=jnp.complex64)
    )
    return (rot @ gamma_diag).astype(jnp.complex64)


def compose_jones(*mats):
    """Pre-multiply a chain of constant 2x2 Jones elements (in application order).

    compose_jones(G1, G2, ...) returns ... @ G2 @ G1, so a chain of constant
    PMD/PDL/rotation stages collapses into ONE streaming pass over the signal
    instead of one full HBM round trip per stage.
    """
    out = jnp.eye(2, dtype=jnp.complex64)
    for m in mats:
        out = m.astype(jnp.complex64) @ out
    return out


# ----------------------------------------------------------------------------
# Kernel bodies: out = Gamma @ signal, complex arithmetic on real planes (VPU)
# ----------------------------------------------------------------------------
def _apply_gamma(g_ref, xr0, xi0, xr1, xi1):
    # Gamma scalars from 1-D SMEM: [g00r,g01r,g10r,g11r, g00i,g01i,g10i,g11i]
    g00r = g_ref[0]; g01r = g_ref[1]; g10r = g_ref[2]; g11r = g_ref[3]
    g00i = g_ref[4]; g01i = g_ref[5]; g10i = g_ref[6]; g11i = g_ref[7]
    or0 = g00r * xr0 - g00i * xi0 + g01r * xr1 - g01i * xi1
    oi0 = g00r * xi0 + g00i * xr0 + g01r * xi1 + g01i * xr1
    or1 = g10r * xr0 - g10i * xi0 + g11r * xr1 - g11i * xi1
    oi1 = g10r * xi0 + g10i * xr0 + g11r * xi1 + g11i * xr1
    return or0, oi0, or1, oi1


def _pdl_kernel_planar(g_ref, x_ref, o_ref):
    # x_ref / o_ref: (2 pol, 2 re/im, ts, 128) float32, lane/sublane dense.
    or0, oi0, or1, oi1 = _apply_gamma(
        g_ref,
        x_ref[0, 0, :, :], x_ref[0, 1, :, :],
        x_ref[1, 0, :, :], x_ref[1, 1, :, :])
    o_ref[0, 0, :, :] = or0
    o_ref[0, 1, :, :] = oi0
    o_ref[1, 0, :, :] = or1
    o_ref[1, 1, :, :] = oi1


def _pdl_kernel_split(g_ref, xr_ref, xi_ref, or_ref, oi_ref):
    # xr/xi/or/oi refs: (2 pol, ts, 128) float32 -- separate re/im streams so
    # the complex wrapper never materializes a stacked intermediate in HBM.
    or0, oi0, or1, oi1 = _apply_gamma(
        g_ref,
        xr_ref[0, :, :], xi_ref[0, :, :],
        xr_ref[1, :, :], xi_ref[1, :, :])
    or_ref[0, :, :] = or0
    oi_ref[0, :, :] = oi0
    or_ref[1, :, :] = or1
    oi_ref[1, :, :] = oi1


# ----------------------------------------------------------------------------
# Tiling helpers
# ----------------------------------------------------------------------------
def _choose_tile(m: int, block_rows: int):
    """Pick tile rows ts (multiple of 8) and padded row count m_pad % ts == 0.

    Prefer a ts that divides m exactly (no ragged last block / masked stores);
    fall back to padding m up to a whole number of blocks.
    """
    ts_max = max(SUB, min((block_rows // SUB) * SUB, m))
    if m % ts_max == 0:
        return ts_max, m
    # Look for a divisor of m in [ts_max/2, ts_max) that is a multiple of 8.
    lo = max(SUB, ((ts_max // 2) // SUB) * SUB)
    for ts in range(ts_max - SUB, lo - 1, -SUB):
        if m % ts == 0:
            return ts, m
    # No good divisor: pad rows up to a multiple of ts_max (bounded waste).
    m_pad = ((m + ts_max - 1) // ts_max) * ts_max
    return ts_max, m_pad


def _vmem_limit(ts: int, user_limit):
    """Scoped-VMEM limit: above actual double-buffered use, below all caps."""
    if user_limit is not None:
        return user_limit
    # (in + out) blocks of 4 f32 planes each, double-buffered, plus headroom.
    needed = 2 * 2 * (2 * 2 * ts * LANE * 4)
    # >= 32 MiB so v5e's 16 MiB scoped default never forces tiny tiles;
    # <= 48 MiB so v7x's 64 MiB physical VMEM keeps headroom for Mosaic scratch.
    return int(min(max(32 << 20, int(needed * 1.25)), 48 << 20))


def _gamma_scalars(gamma):
    gre = jnp.real(gamma).astype(jnp.float32).reshape(-1)
    gim = jnp.imag(gamma).astype(jnp.float32).reshape(-1)
    return jnp.concatenate([gre, gim])   # (8,) float32, lives in SMEM


def _compiler_params(ts, vmem_limit_bytes):
    # "parallel" lets Mosaic shard grid steps across v7x's two TensorCores
    # (no-op on single-TC v5e/v6e).  If an xprof trace on v7x shows only one
    # TC active, switch this axis to pltpu.CORE_PARALLEL.
    return pltpu.CompilerParams(
        dimension_semantics=("parallel",),
        vmem_limit_bytes=_vmem_limit(ts, vmem_limit_bytes),
    )


# ----------------------------------------------------------------------------
# Entry points
# ----------------------------------------------------------------------------
def pdl_forward_planar(gamma: jnp.ndarray, sig_ri: jnp.ndarray, *,
                       block_rows: int = 2048, vmem_limit_bytes=None):
    """Apply Gamma @ signal on a planar float32 signal (preferred fast path).

    gamma:  (2, 2) complex64
    sig_ri: (2, 2, N) float32 -- (polarization, re/im, time)
    returns (2, 2, N) float32 in the same planar layout.

    block_rows=2048 moves ~8 MiB of HBM traffic per grid step (default
    double-buffered VMEM use ~16 MiB).  v5e/v6e can go up to 4096 with a
    larger vmem_limit_bytes; keep block_rows <= 4096 on v7x (64 MiB VMEM).
    """
    assert gamma.shape == (2, 2)
    assert sig_ri.ndim == 3 and sig_ri.shape[0] == 2 and sig_ri.shape[1] == 2
    n = sig_ri.shape[2]

    m0 = -(-n // (SUB * LANE)) * SUB          # rows after padding to 8*128
    ts, m = _choose_tile(m0, block_rows)
    n_pad = m * LANE
    if n_pad != n:
        sig_ri = jnp.pad(sig_ri, ((0, 0), (0, 0), (0, n_pad - n)))

    x = sig_ri.astype(jnp.float32).reshape(2, 2, m, LANE)
    g_flat = _gamma_scalars(gamma)

    blk = pl.BlockSpec((2, 2, ts, LANE), lambda i: (0, 0, i, 0))

    out = pl.pallas_call(
        _pdl_kernel_planar,
        out_shape=jax.ShapeDtypeStruct((2, 2, m, LANE), jnp.float32),
        grid_spec=pl.GridSpec(
            grid=(m // ts,),
            in_specs=[pl.BlockSpec(memory_space=pltpu.MemorySpace.SMEM), blk],
            out_specs=blk,
        ),
        compiler_params=_compiler_params(ts, vmem_limit_bytes),
    )(g_flat, x)

    out = out.reshape(2, 2, n_pad)
    if n_pad != n:
        out = out[:, :, :n]
    return out


def pdl_forward(gamma: jnp.ndarray, signal: jnp.ndarray, *,
                block_rows: int = 2048, vmem_limit_bytes=None):
    """Complex wrapper matching torch PDLElement.forward: (2,2) Gamma @ (2,N).

    Real/imag planes are passed to the kernel as two separate inputs and
    returned as two separate outputs (no stacked (2,2,N) intermediate), so the
    only extra HBM traffic vs. the planar path is the unavoidable
    complex<->planar conversion.  For bandwidth-critical pipelines keep the
    planar layout persistent and use pdl_forward_planar(); to collapse a chain
    of constant Jones stages into one pass, pre-multiply with compose_jones().
    """
    assert gamma.shape == (2, 2)
    assert signal.ndim == 2 and signal.shape[0] == 2
    n = signal.shape[1]

    m0 = -(-n // (SUB * LANE)) * SUB
    ts, m = _choose_tile(m0, block_rows)
    n_pad = m * LANE
    if n_pad != n:
        signal = jnp.pad(signal, ((0, 0), (0, n_pad - n)))

    xr = jnp.real(signal).astype(jnp.float32).reshape(2, m, LANE)
    xi = jnp.imag(signal).astype(jnp.float32).reshape(2, m, LANE)
    g_flat = _gamma_scalars(gamma)

    blk = pl.BlockSpec((2, ts, LANE), lambda i: (0, i, 0))

    out_re, out_im = pl.pallas_call(
        _pdl_kernel_split,
        out_shape=(jax.ShapeDtypeStruct((2, m, LANE), jnp.float32),
                   jax.ShapeDtypeStruct((2, m, LANE), jnp.float32)),
        grid_spec=pl.GridSpec(
            grid=(m // ts,),
            in_specs=[pl.BlockSpec(memory_space=pltpu.MemorySpace.SMEM), blk, blk],
            out_specs=[blk, blk],
        ),
        compiler_params=_compiler_params(ts, vmem_limit_bytes),
    )(g_flat, xr, xi)

    out = lax.complex(out_re.reshape(2, n_pad),
                      out_im.reshape(2, n_pad)).astype(jnp.complex64)
    if n_pad != n:
        out = out[:, :n]
    return out


# ----------------------------------------------------------------------------
# Demo / self-check
# ----------------------------------------------------------------------------
if __name__ == "__main__":
    key = jax.random.PRNGKey(0)
    k_gamma, k_sr, k_si = jax.random.split(key, 3)

    rho = 0.2
    gamma = make_gamma(rho, k_gamma)

    # Dual-polarization complex signal, shape (2, N).
    N = 2048
    sig_re = jax.random.normal(k_sr, (2, N), dtype=jnp.float32)
    sig_im = jax.random.normal(k_si, (2, N), dtype=jnp.float32)
    signal = (sig_re + 1j * sig_im).astype(jnp.complex64)

    # Reference: plain JAX complex matmul (semantics of torch.matmul(Gamma, signal)).
    ref = gamma @ signal

    # 1) Complex path (matches the torch forward signature), default tiling.
    out = jax.block_until_ready(pdl_forward(gamma, signal))
    np.testing.assert_allclose(np.asarray(out), np.asarray(ref), rtol=1e-5, atol=1e-5)

    # 2) Planar fast path, tiny block_rows to exercise a multi-step grid.
    sig_ri = jnp.stack([sig_re, sig_im], axis=1)
    out_ri = jax.block_until_ready(
        pdl_forward_planar(gamma, sig_ri, block_rows=8))
    out2 = (out_ri[:, 0, :] + 1j * out_ri[:, 1, :]).astype(jnp.complex64)
    np.testing.assert_allclose(np.asarray(out2), np.asarray(ref), rtol=1e-5, atol=1e-5)

    # 3) Awkward N (not a lane multiple) exercising the pad-and-slice path.
    N2 = 1000
    sig2 = (jax.random.normal(k_sr, (2, N2), dtype=jnp.float32)
            + 1j * jax.random.normal(k_si, (2, N2), dtype=jnp.float32)
            ).astype(jnp.complex64)
    out3 = jax.block_until_ready(pdl_forward(gamma, sig2))
    np.testing.assert_allclose(np.asarray(out3), np.asarray(gamma @ sig2),
                               rtol=1e-5, atol=1e-5)

    # 4) Fused chain of two constant Jones elements applied in one HBM pass.
    gamma2 = make_gamma(0.1, k_si)
    fused = compose_jones(gamma, gamma2)            # signal -> gamma -> gamma2
    out4 = jax.block_until_ready(pdl_forward(fused, signal))
    np.testing.assert_allclose(np.asarray(out4),
                               np.asarray(gamma2 @ (gamma @ signal)),
                               rtol=1e-4, atol=1e-4)

    print("KERNEL_OK")
</pallas_src>

<mosaic_0001>
module attributes {stable_mosaic.version = 11 : i64} {
  func.func @_pdl_kernel_split(%arg0: i32, %arg1: memref<8xf32, #tpu.memory_space<smem>>, %arg2: memref<2x16x128xf32, #tpu.memory_space<vmem>>, %arg3: memref<2x16x128xf32, #tpu.memory_space<vmem>>, %arg4: memref<2x16x128xf32, #tpu.memory_space<vmem>>, %arg5: memref<2x16x128xf32, #tpu.memory_space<vmem>>) attributes {dimension_semantics = [#tpu.dimension_semantics<parallel>], iteration_bounds = array<i64: 1>, scalar_prefetch = 0 : i64, scratch_operands = 0 : i64, tpu.core_type = #tpu.core_type<tc>, window_params = [{transform_indices = @transform_0, window_bounds = array<i64: 8>}, {transform_indices = @transform_1, window_bounds = array<i64: 2, 16, 128>}, {transform_indices = @transform_2, window_bounds = array<i64: 2, 16, 128>}, {transform_indices = @transform_3, window_bounds = array<i64: 2, 16, 128>}, {transform_indices = @transform_4, window_bounds = array<i64: 2, 16, 128>}]} {
    %c0 = arith.constant 0 : index
    %c0_0 = arith.constant 0 : index
    %c0_1 = arith.constant 0 : index
    %0 = vector.load %arg2[%c0, %c0_0, %c0_1] : memref<2x16x128xf32, #tpu.memory_space<vmem>>, vector<1x16x128xf32>
    %1 = vector.shape_cast %0 : vector<1x16x128xf32> to vector<16x128xf32>
    %c0_2 = arith.constant 0 : index
    %c0_3 = arith.constant 0 : index
    %c0_4 = arith.constant 0 : index
    %2 = vector.load %arg3[%c0_2, %c0_3, %c0_4] : memref<2x16x128xf32, #tpu.memory_space<vmem>>, vector<1x16x128xf32>
    %3 = vector.shape_cast %2 : vector<1x16x128xf32> to vector<16x128xf32>
    %c1 = arith.constant 1 : index
    %c0_5 = arith.constant 0 : index
    %c0_6 = arith.constant 0 : index
    %4 = vector.load %arg2[%c1, %c0_5, %c0_6] : memref<2x16x128xf32, #tpu.memory_space<vmem>>, vector<1x16x128xf32>
    %5 = vector.shape_cast %4 : vector<1x16x128xf32> to vector<16x128xf32>
    %c1_7 = arith.constant 1 : index
    %c0_8 = arith.constant 0 : index
    %c0_9 = arith.constant 0 : index
    %6 = vector.load %arg3[%c1_7, %c0_8, %c0_9] : memref<2x16x128xf32, #tpu.memory_space<vmem>>, vector<1x16x128xf32>
    %7 = vector.shape_cast %6 : vector<1x16x128xf32> to vector<16x128xf32>
    %c0_10 = arith.constant 0 : index
    %8 = memref.load %arg1[%c0_10] : memref<8xf32, #tpu.memory_space<smem>>
    %c1_11 = arith.constant 1 : index
    %9 = memref.load %arg1[%c1_11] : memref<8xf32, #tpu.memory_space<smem>>
    %c2 = arith.constant 2 : index
    %10 = memref.load %arg1[%c2] : memref<8xf32, #tpu.memory_space<smem>>
    %c3 = arith.constant 3 : index
    %11 = memref.load %arg1[%c3] : memref<8xf32, #tpu.memory_space<smem>>
    %c4 = arith.constant 4 : index
    %12 = memref.load %arg1[%c4] : memref<8xf32, #tpu.memory_space<smem>>
    %c5 = arith.constant 5 : index
    %13 = memref.load %arg1[%c5] : memref<8xf32, #tpu.memory_space<smem>>
    %c6 = arith.constant 6 : index
    %14 = memref.load %arg1[%c6] : memref<8xf32, #tpu.memory_space<smem>>
    %c7 = arith.constant 7 : index
    %15 = memref.load %arg1[%c7] : memref<8xf32, #tpu.memory_space<smem>>
    %16 = vector.broadcast %8 : f32 to vector<16x128xf32>
    %17 = arith.mulf %16, %1 : vector<16x128xf32>
    %18 = vector.broadcast %12 : f32 to vector<16x128xf32>
    %19 = arith.mulf %18, %3 : vector<16x128xf32>
    %20 = arith.subf %17, %19 : vector<16x128xf32>
    %21 = vector.broadcast %9 : f32 to vector<16x128xf32>
    %22 = arith.mulf %21, %5 : vector<16x128xf32>
    %23 = arith.addf %20, %22 : vector<16x128xf32>
    %24 = vector.broadcast %13 : f32 to vector<16x128xf32>
    %25 = arith.mulf %24, %7 : vector<16x128xf32>
    %26 = arith.subf %23, %25 : vector<16x128xf32>
    %27 = vector.broadcast %8 : f32 to vector<16x128xf32>
    %28 = arith.mulf %27, %3 : vector<16x128xf32>
    %29 = vector.broadcast %12 : f32 to vector<16x128xf32>
    %30 = arith.mulf %29, %1 : vector<16x128xf32>
    %31 = arith.addf %28, %30 : vector<16x128xf32>
    %32 = vector.broadcast %9 : f32 to vector<16x128xf32>
    %33 = arith.mulf %32, %7 : vector<16x128xf32>
    %34 = arith.addf %31, %33 : vector<16x128xf32>
    %35 = vector.broadcast %13 : f32 to vector<16x128xf32>
    %36 = arith.mulf %35, %5 : vector<16x128xf32>
    %37 = arith.addf %34, %36 : vector<16x128xf32>
    %38 = vector.broadcast %10 : f32 to vector<16x128xf32>
    %39 = arith.mulf %38, %1 : vector<16x128xf32>
    %40 = vector.broadcast %14 : f32 to vector<16x128xf32>
    %41 = arith.mulf %40, %3 : vector<16x128xf32>
    %42 = arith.subf %39, %41 : vector<16x128xf32>
    %43 = vector.broadcast %11 : f32 to vector<16x128xf32>
    %44 = arith.mulf %43, %5 : vector<16x128xf32>
    %45 = arith.addf %42, %44 : vector<16x128xf32>
    %46 = vector.broadcast %15 : f32 to vector<16x128xf32>
    %47 = arith.mulf %46, %7 : vector<16x128xf32>
    %48 = arith.subf %45, %47 : vector<16x128xf32>
    %49 = vector.broadcast %10 : f32 to vector<16x128xf32>
    %50 = arith.mulf %49, %3 : vector<16x128xf32>
    %51 = vector.broadcast %14 : f32 to vector<16x128xf32>
    %52 = arith.mulf %51, %1 : vector<16x128xf32>
    %53 = arith.addf %50, %52 : vector<16x128xf32>
    %54 = vector.broadcast %11 : f32 to vector<16x128xf32>
    %55 = arith.mulf %54, %7 : vector<16x128xf32>
    %56 = arith.addf %53, %55 : vector<16x128xf32>
    %57 = vector.broadcast %15 : f32 to vector<16x128xf32>
    %58 = arith.mulf %57, %5 : vector<16x128xf32>
    %59 = arith.addf %56, %58 : vector<16x128xf32>
    %c0_12 = arith.constant 0 : index
    %c0_13 = arith.constant 0 : index
    %c0_14 = arith.constant 0 : index
    %60 = vector.load %arg4[%c0_12, %c0_13, %c0_14] : memref<2x16x128xf32, #tpu.memory_space<vmem>>, vector<1x16x128xf32>
    %61 = vector.shape_cast %60 : vector<1x16x128xf32> to vector<16x128xf32>
    %62 = vector.shape_cast %26 : vector<16x128xf32> to vector<1x16x128xf32>
    tpu.vector_store %arg4[%c0_12, %c0_13, %c0_14], %62 {strides = array<i32>} : memref<2x16x128xf32, #tpu.memory_space<vmem>>, vector<1x16x128xf32>,
    %c0_15 = arith.constant 0 : index
    %c0_16 = arith.constant 0 : index
    %c0_17 = arith.constant 0 : index
    %63 = vector.load %arg5[%c0_15, %c0_16, %c0_17] : memref<2x16x128xf32, #tpu.memory_space<vmem>>, vector<1x16x128xf32>
    %64 = vector.shape_cast %63 : vector<1x16x128xf32> to vector<16x128xf32>
    %65 = vector.shape_cast %37 : vector<16x128xf32> to vector<1x16x128xf32>
    tpu.vector_store %arg5[%c0_15, %c0_16, %c0_17], %65 {strides = array<i32>} : memref<2x16x128xf32, #tpu.memory_space<vmem>>, vector<1x16x128xf32>,
    %c1_18 = arith.constant 1 : index
    %c0_19 = arith.constant 0 : index
    %c0_20 = arith.constant 0 : index
    %66 = vector.load %arg4[%c1_18, %c0_19, %c0_20] : memref<2x16x128xf32, #tpu.memory_space<vmem>>, vector<1x16x128xf32>
    %67 = vector.shape_cast %66 : vector<1x16x128xf32> to vector<16x128xf32>
    %68 = vector.shape_cast %48 : vector<16x128xf32> to vector<1x16x128xf32>
    tpu.vector_store %arg4[%c1_18, %c0_19, %c0_20], %68 {strides = array<i32>} : memref<2x16x128xf32, #tpu.memory_space<vmem>>, vector<1x16x128xf32>,
    %c1_21 = arith.constant 1 : index
    %c0_22 = arith.constant 0 : index
    %c0_23 = arith.constant 0 : index
    %69 = vector.load %arg5[%c1_21, %c0_22, %c0_23] : memref<2x16x128xf32, #tpu.memory_space<vmem>>, vector<1x16x128xf32>
    %70 = vector.shape_cast %69 : vector<1x16x128xf32> to vector<16x128xf32>
    %71 = vector.shape_cast %59 : vector<16x128xf32> to vector<1x16x128xf32>
    tpu.vector_store %arg5[%c1_21, %c0_22, %c0_23], %71 {strides = array<i32>} : memref<2x16x128xf32, #tpu.memory_space<vmem>>, vector<1x16x128xf32>,
    return
  }
  func.func @transform_0(%arg0: i32) -> i32 {
    %c0_i32 = arith.constant 0 : i32
    %c0_i32_0 = arith.constant 0 : i32
    return %c0_i32 : i32
  }
  func.func @transform_1(%arg0: i32) -> (i32, i32, i32) {
    %c0_i32 = arith.constant 0 : i32
    %c0_i32_0 = arith.constant 0 : i32
    %c0_i32_1 = arith.constant 0 : i32
    return %c0_i32, %arg0, %c0_i32_0 : i32, i32, i32
  }
  func.func @transform_2(%arg0: i32) -> (i32, i32, i32) {
    %c0_i32 = arith.constant 0 : i32
    %c0_i32_0 = arith.constant 0 : i32
    %c0_i32_1 = arith.constant 0 : i32
    return %c0_i32, %arg0, %c0_i32_0 : i32, i32, i32
  }
  func.func @transform_3(%arg0: i32) -> (i32, i32, i32) {
    %c0_i32 = arith.constant 0 : i32
    %c0_i32_0 = arith.constant 0 : i32
    %c0_i32_1 = arith.constant 0 : i32
    return %c0_i32, %arg0, %c0_i32_0 : i32, i32, i32
  }
  func.func @transform_4(%arg0: i32) -> (i32, i32, i32) {
    %c0_i32 = arith.constant 0 : i32
    %c0_i32_0 = arith.constant 0 : i32
    %c0_i32_1 = arith.constant 0 : i32
    return %c0_i32, %arg0, %c0_i32_0 : i32, i32, i32
  }
}

</mosaic_0001>

<bundles_post_ra>
// kernel: tpu_custom_call.1
= control target key start
LH: loop header
LB: loop body
LE: loop exit
PB: predicated region body
PF: predicated region fallthrough
CT: control target
= control target key end

     0   :  { %10 = vsyncpa [#allocation5], 0  ;;  %s379_s0 = inlined_call_operand.hbm [shape: f32[8], index: 0, kind: input, shape index: {}]   ;;  %s380_s1 = inlined_call_operand.hbm [shape: f32[2,16,128], index: 1, kind: input, shape index: {}]   ;;  %s381_s2 = inlined_call_operand.hbm [shape: f32[2,16,128], index: 2, kind: input, shape index: {}]   ;;  %s382_s3 = inlined_call_operand.hbm [shape: f32[2,16,128], index: 3, kind: output, shape index: {0}]   ;;  %s383_s4 = inlined_call_operand.hbm [shape: f32[2,16,128], index: 4, kind: output, shape index: {1}]  }
   0x1   :  { %11 = vsyncpa [#allocation3], 0 }
   0x2   :  { %12 = vsyncpa [#allocation8], 0 }
   0x3   :  { %13 = vsyncpa [#allocation4], 0 }
   0x4   :  { %14 = vsyncpa [#allocation11], 0  ;;  %s296_s15 = smov [#allocation2]   ;;  %s297_s18 = smov [#allocation6]  }
   0x5   :  { %22 = dma.hbm_to_smem %s379_s0, 16, %s296_s15, [#allocation5]  }
   0x6   :  { %s28_s19 = sshll.u32 %s297_s18, 4  ;;  %s29_s19 = int_to_ptr.vmem [resolvable:$true] %s28_s19 }
   0x7   :  { %s214_s20 = scalar_lea.vmem %s29_s19, 512  ;;  %p219_p1 = scmp.lt.s32.totalorder %s29_s19, %s29_s19 }
   0x8   :  { %p215_p0 = scmp.ne.s32.totalorder %s29_s19, %s214_s20  ;;  %p220_p2 = scmp.lt.s32.totalorder %s214_s20, %s214_s20 }
   0xa   :  { %p221_p3 = por %p220_p2, %p219_p1 }
   0xc   :  { %p222_p4 = pnand %p221_p3, %p215_p0 }
   0xe   :  { %225 = shalt.err (!%p222_p4)
}
   0xf   :  { %s298_s21 = smov 128   ;;  %s299_s22 = smov 8  }
  0x10   :  { %34 = dma.hbm_to_vmem [thread:$0]  %s380_s1, 512, %s29_s19, [#allocation3], %s298_s21, %s298_s21, %s299_s22  }
  0x11   :  { %s300_s0 = smov [#allocation7]  }
  0x12   :  { %s40_s25 = sshll.u32 %s300_s0, 4  ;;  %s41_s25 = int_to_ptr.vmem [resolvable:$true] %s40_s25 }
  0x13   :  { %s234_s26 = scalar_lea.vmem %s41_s25, 512  ;;  %p239_p6 = scmp.lt.s32.totalorder %s41_s25, %s41_s25 }
  0x14   :  { %p235_p5 = scmp.ne.s32.totalorder %s41_s25, %s234_s26  ;;  %p240_p7 = scmp.lt.s32.totalorder %s234_s26, %s234_s26 }
  0x16   :  { %p241_p8 = por %p240_p7, %p239_p6 }
  0x18   :  { %p242_p9 = pnand %p241_p8, %p235_p5 }
  0x1a   :  { %245 = shalt.err (!%p242_p9)
}
  0x1b   :  { %46 = dma.hbm_to_vmem [thread:$0]  %s381_s2, 512, %s41_s25, [#allocation8], %s298_s21, %s298_s21, %s299_s22  }
  0x1c   :  { %286 = dma.done.wait [#allocation5], 16  }
  0x1d   :  { %287 = vsyncadd [#allocation5], 4294967280 }
  0x1e   :  { %288 = dma.done.wait [#allocation3], 512  }
  0x1f   :  { %289 = vsyncadd [#allocation3], 4294966784 }
  0x20   :  { %290 = dma.done.wait [#allocation8], 512  }
  0x21   :  { %291 = vsyncadd [#allocation8], 4294966784 }
  0x22   :  { %56 = sfence }
  0x23   :  { %s67_s1 = sld [smem:[#allocation2]]  ;;  %v57_v0 = vld [vmem:[#allocation6] sm:$0xff]  ;;  %v343_v2 = vld [vmem:[#allocation6 + $0x8] sm:$0xff]  ;;  %v347_v3 = vld [vmem:[#allocation6 + $0x10] sm:$0xff]  ;;  %s301_s9 = smov [#allocation9]  }
  0x24   :  { %s184_s29 = sld [smem:[#allocation2 + $0x1]]  ;;  %v59_v1 = vld [vmem:[#allocation7] sm:$0xff]  ;;  %v65_v4 = vld [vmem:[#allocation7 + $0x10] sm:$0xff]  ;;  %v349_v5 = vld [vmem:[#allocation6 + $0x18] sm:$0xff]  ;;  %s154_s10 = sshll.u32 %s301_s9, 4  ;;  %s155_s10 = int_to_ptr.vmem [resolvable:$true] %s154_s10 }
  0x25   :  { %s187_s30 = sld [smem:[#allocation2 + $0x4]]  ;;  %v60_v7 = vld [vmem:[#allocation7 + $0x8] sm:$0xff]  ;;  %v66_v18 = vld [vmem:[#allocation7 + $0x18] sm:$0xff]  ;;  %s302_s11 = smov [#allocation10]  }
  0x26   :  { %s188_s5 = sld [smem:[#allocation2 + $0x5]]  ;;  %s166_s12 = sshll.u32 %s302_s11, 4  ;;  %s167_s12 = int_to_ptr.vmem [resolvable:$true] %s166_s12 }
  0x27   :  { %s345_s6 = sld [smem:[#allocation2 + $0x2]]  ;;  %s246_s13 = scalar_lea.vmem %s155_s10, 512 }
  0x28   :  { %s351_s2 = sld [smem:[#allocation2 + $0x3]]  ;;  %p247_p10 = scmp.ne.s32.totalorder %s155_s10, %s246_s13 }
  0x29   :  { %v75_v6 = vstv %s67_s1  ;;  %s189_s7 = sld [smem:[#allocation2 + $0x6]]  ;;  %p251_p11 = scmp.lt.s32.totalorder %s155_s10, %s155_s10 }
  0x2a   :  { %v76_v8 = vmul.f32 %v75_v6, %v57_v0  ;;  %v83_v9 = vstv %s184_s29  ;;  %v77_v10 = vmul.f32 %v75_v6, %v343_v2  ;;  %v93_v11 = vmul.f32 %v75_v6, %v59_v1  ;;  %s190_s8 = sld [smem:[#allocation2 + $0x7]]  ;;  %p252_p12 = scmp.lt.s32.totalorder %s246_s13, %s246_s13 }
  0x2b   :  { %v78_v12 = vstv %s187_s30  ;;  %v84_v13 = vmul.f32 %v83_v9, %v347_v3  ;;  %v85_v14 = vmul.f32 %v83_v9, %v349_v5  ;;  %v99_v15 = vmul.f32 %v83_v9, %v65_v4 }
  0x2c   :  { %v79_v16 = vmul.f32 %v78_v12, %v59_v1  ;;  %v88_v17 = vstv %s188_s5  ;;  %v80_v19 = vmul.f32 %v78_v12, %v60_v7  ;;  %v95_v20 = vmul.f32 %v78_v12, %v57_v0  ;;  %p253_p13 = por %p252_p12, %p251_p11 }
  0x2d   :  { %v89_v21 = vmul.f32 %v88_v17, %v65_v4  ;;  %v90_v22 = vmul.f32 %v88_v17, %v66_v18  ;;  %v103_v23 = vmul.f32 %v88_v17, %v347_v3  ;;  %v94_v24 = vmul.f32 %v75_v6, %v60_v7 }
  0x2e   :  { %v81_v25 = vsub.f32 %v76_v8, %v79_v16  ;;  %v82_v26 = vsub.f32 %v77_v10, %v80_v19  ;;  %v97_v27 = vadd.f32 %v95_v20, %v93_v11  ;;  %v96_v28 = vmul.f32 %v78_v12, %v343_v2  ;;  %p254_p0 = pnand %p253_p13, %p247_p10 }
  0x2f   :  { %v100_v29 = vmul.f32 %v83_v9, %v66_v18  ;;  %v104_v30 = vmul.f32 %v88_v17, %v349_v5  ;;  %v107_v31 = vstv %s345_s6  ;;  %v110_v32 = vstv %s189_s7 }
  0x30   :  { %v86_v33 = vadd.f32 %v84_v13, %v81_v25  ;;  %v87_v34 = vadd.f32 %v85_v14, %v82_v26  ;;  %v101_v35 = vadd.f32 %v99_v15, %v97_v27  ;;  %v98_v36 = vadd.f32 %v96_v28, %v94_v24 }
  0x31   :  { %v108_v37 = vmul.f32 %v107_v31, %v57_v0  ;;  %v111_v38 = vmul.f32 %v110_v32, %v59_v1  ;;  %v115_v39 = vstv %s351_s2  ;;  %v120_v40 = vstv %s190_s8 }
  0x32   :  { %v91_v41 = vsub.f32 %v86_v33, %v89_v21  ;;  %v92_v42 = vsub.f32 %v87_v34, %v90_v22  ;;  %v105_v43 = vadd.f32 %v103_v23, %v101_v35  ;;  %v102_v44 = vadd.f32 %v100_v29, %v98_v36 }
  0x33   :  { %v113_v45 = vsub.f32 %v108_v37, %v111_v38  ;;  %v116_v46 = vmul.f32 %v115_v39, %v347_v3  ;;  %v121_v47 = vmul.f32 %v120_v40, %v65_v4  ;;  %v109_v48 = vmul.f32 %v107_v31, %v343_v2 }
  0x34   :  { %139 = vst [vmem:[#allocation9] sm:$0xff] %v91_v41  ;;  %140 = vst [vmem:[#allocation9 + $0x8] sm:$0xff] %v92_v42  ;;  %v106_v49 = vadd.f32 %v104_v30, %v102_v44  ;;  %v112_v50 = vmul.f32 %v110_v32, %v60_v7  ;;  %v117_v51 = vmul.f32 %v115_v39, %v349_v5 }
  0x35   :  { %141 = vst [vmem:[#allocation10] sm:$0xff] %v105_v43  ;;  %v118_v52 = vadd.f32 %v116_v46, %v113_v45  ;;  %v125_v53 = vmul.f32 %v107_v31, %v59_v1  ;;  %v127_v54 = vmul.f32 %v110_v32, %v57_v0  ;;  %v131_v55 = vmul.f32 %v115_v39, %v65_v4 }
  0x36   :  { %142 = vst [vmem:[#allocation10 + $0x8] sm:$0xff] %v106_v49  ;;  %v114_v56 = vsub.f32 %v109_v48, %v112_v50  ;;  %v122_v57 = vmul.f32 %v120_v40, %v66_v18  ;;  %v126_v58 = vmul.f32 %v107_v31, %v60_v7  ;;  %v128_v59 = vmul.f32 %v110_v32, %v343_v2 }
  0x37   :  { %v123_v60 = vsub.f32 %v118_v52, %v121_v47  ;;  %v129_v61 = vadd.f32 %v127_v54, %v125_v53  ;;  %v135_v62 = vmul.f32 %v120_v40, %v347_v3  ;;  %v132_v63 = vmul.f32 %v115_v39, %v66_v18 }
  0x38   :  { %v119_v6 = vadd.f32 %v117_v51, %v114_v56  ;;  %v130_v8 = vadd.f32 %v128_v59, %v126_v58  ;;  %v136_v9 = vmul.f32 %v120_v40, %v349_v5 }
  0x39   :  { %144 = vst [vmem:[#allocation9 + $0x10] sm:$0xff] %v123_v60  ;;  %v133_v0 = vadd.f32 %v131_v55, %v129_v61 }
  0x3a   :  { %v124_v1 = vsub.f32 %v119_v6, %v122_v57  ;;  %v134_v4 = vadd.f32 %v132_v63, %v130_v8 }
  0x3b   :  { %v137_v7 = vadd.f32 %v135_v62, %v133_v0 }
  0x3c   :  { %145 = vst [vmem:[#allocation9 + $0x18] sm:$0xff] %v124_v1  ;;  %v138_v2 = vadd.f32 %v136_v9, %v134_v4 }
  0x3d   :  { %147 = vst [vmem:[#allocation10 + $0x10] sm:$0xff] %v137_v7 }
  0x3e   :  { %257 = shalt.err (!%p254_p0)
}
  0x3f   :  { %160 = dma.vmem_to_hbm [thread:$0]  %s155_s10, 512, %s382_s3, [#allocation4], %s298_s21, %s298_s21, %s299_s22   ;;  %148 = vst [vmem:[#allocation10 + $0x18] sm:$0xff] %v138_v2 }
  0x40   :  { %s266_s16 = scalar_lea.vmem %s167_s12, 512  ;;  %p271_p2 = scmp.lt.s32.totalorder %s167_s12, %s167_s12 }
  0x41   :  { %p267_p1 = scmp.ne.s32.totalorder %s167_s12, %s266_s16  ;;  %p272_p3 = scmp.lt.s32.totalorder %s266_s16, %s266_s16 }
  0x43   :  { %p273_p4 = por %p272_p3, %p271_p2 }
  0x45   :  { %p274_p5 = pnand %p273_p4, %p267_p1 }
  0x47   :  { %277 = shalt.err (!%p274_p5)
}
  0x48   :  { %172 = dma.vmem_to_hbm [thread:$0]  %s167_s12, 512, %s383_s4, [#allocation11], %s298_s21, %s298_s21, %s299_s22  }
  0x49   :  { %292 = dma.done.wait [#allocation4], 512  }
  0x4a   :  { %293 = vsyncadd [#allocation4], 4294966784 }
  0x4b   :  { %294 = dma.done.wait [#allocation11], 512  }
  0x4c   :  { %295 = vsyncadd [#allocation11], 4294966784 }
  0x4d   :  { %179 = vsyncpa [#allocation3], 1 }
  0x4e   :  { %180 = vsyncpa [#allocation8], 1 }
  0x4f   :  { %181 = vsyncpa [#allocation4], 1 }
  0x50   :  { %182 = vsyncpa [#allocation11], 1 }
  0x51   :  { %183 = vsyncpa [#allocation5], 1 }

</bundles_post_ra>
